<compile_context>
chip_gen: v7x
topology: tpu7x:2x2x1
jax: 0.10.0
libtpu: 0.0.40
codegen_flags: <defaults>
</compile_context>

<pallas_src>
import math
import functools

import jax
import jax.numpy as jnp
import numpy as np
from jax.experimental import pallas as pl
from jax.experimental.pallas import tpu as pltpu

_LANE = 128      # vreg lane width   (last dim)
_SUBLANE = 8     # vreg sublane count (second-to-last dim)


def _round_up(x, m):
    return (x + m - 1) // m * m


# --------------------------------------------------------------------------
# Fused per-layer kernel: chunk input GEMM + serial tanh recurrence (+ sigmoid)
# --------------------------------------------------------------------------
def rnn_layer_kernel(x_ref, wih_hbm, whh_hbm, b_hbm, out_ref,
                     wih_scr, whh_scr, b_scr, xp_scr, h_scr, sem,
                     *, t_blk, unroll, is_last):
    """grid = (T // t_blk,); the time axis is a carried recurrence ("arbitrary").

    Per grid step:
      (1) xproj = x_chunk @ W_ih^T + (b_ih + b_hh)   -- one MXU pass, hoisted
      (2) for tau in chunk:  h = tanh(xproj[tau] + h @ W_hh^T)
    Non-last layers write the full (t_blk, B, H) activation block; the last
    layer writes only sigmoid(h_T) of shape (B, H) on the final grid step.
    """
    t = pl.program_id(0)

    @pl.when(t == 0)
    def _init():
        # Load-once weights: single-buffered VMEM residents (not double-buffered
        # BlockSpec blocks); scratch persists across all grid steps.
        copies = (pltpu.make_async_copy(wih_hbm, wih_scr, sem.at[0]),
                  pltpu.make_async_copy(whh_hbm, whh_scr, sem.at[1]),
                  pltpu.make_async_copy(b_hbm, b_scr, sem.at[2]))
        for c in copies:
            c.start()
        for c in copies:
            c.wait()
        h_scr[...] = jnp.zeros_like(h_scr)          # h0 = 0 (forward passes None)
        if is_last:
            out_ref[...] = jnp.zeros_like(out_ref)  # resident-output insurance

    # (1) Chunk input projection, hoisted out of the serial recurrence.
    #     bf16/f32 operands -> f32 accumulate; bias add stays f32.
    xp_scr[...] = (
        jnp.einsum("tbi,ih->tbh", x_ref[...], wih_scr[...],
                   preferred_element_type=jnp.float32)
        + b_scr[...])

    # (2) Serial recurrence; only h @ W_hh^T remains inside the time loop.
    def step(tau, h):
        rec = jnp.dot(h.astype(whh_scr.dtype), whh_scr[...],
                      preferred_element_type=jnp.float32)
        h_new = jnp.tanh(xp_scr[tau] + rec)         # f32 elementwise, f32 carry
        if not is_last:                             # static python flag
            out_ref[tau] = h_new.astype(out_ref.dtype)
        return h_new

    h_final = jax.lax.fori_loop(0, t_blk, step, h_scr[...], unroll=unroll)
    h_scr[...] = h_final

    if is_last:
        @pl.when(t == pl.num_programs(0) - 1)
        def _final():
            out_ref[...] = jax.nn.sigmoid(h_final).astype(out_ref.dtype)


# --------------------------------------------------------------------------
# Per-layer wrapper
# --------------------------------------------------------------------------
def rnn_layer_pallas(x_tbi, w_ih_t, w_hh_t, bias, *, t_blk, is_last, out_dtype):
    """One RNN layer over the full (padded) sequence.  x_tbi: (T, B_pad, I)."""
    T, B_pad, I = x_tbi.shape
    H_pad = w_hh_t.shape[1]
    assert T % t_blk == 0, "T must be divisible by t_blk"

    if is_last:
        out_shape = jax.ShapeDtypeStruct((B_pad, H_pad), out_dtype)
        out_specs = pl.BlockSpec((B_pad, H_pad), lambda t: (0, 0))
        out_buf = B_pad * H_pad * jnp.dtype(out_dtype).itemsize
    else:
        out_shape = jax.ShapeDtypeStruct((T, B_pad, H_pad), out_dtype)
        out_specs = pl.BlockSpec((t_blk, B_pad, H_pad), lambda t: (t, 0, 0))
        out_buf = 2 * t_blk * B_pad * H_pad * jnp.dtype(out_dtype).itemsize

    # Rough VMEM footprint: 2x-buffered x blocks + load-once weights +
    # f32 xproj / h scratch + output buffers.  Raise the scoped-VMEM cap only
    # when needed (v5e default is 16 MiB); never above v7x's 64 MiB physical.
    in_item = jnp.dtype(x_tbi.dtype).itemsize
    w_item = jnp.dtype(w_ih_t.dtype).itemsize
    est = (2 * t_blk * B_pad * I * in_item
           + (I * H_pad + H_pad * H_pad) * w_item + 4 * H_pad
           + 4 * t_blk * B_pad * H_pad + 4 * B_pad * H_pad + out_buf)
    vmem_limit = min(int(est * 1.5), 64 << 20) if est > (24 << 20) else None

    kernel = functools.partial(rnn_layer_kernel, t_blk=t_blk,
                               unroll=min(t_blk, 8), is_last=is_last)
    return pl.pallas_call(
        kernel,
        out_shape=out_shape,
        grid=(T // t_blk,),
        in_specs=[
            pl.BlockSpec((t_blk, B_pad, I), lambda t: (t, 0, 0)),  # x chunk
            pl.BlockSpec(memory_space=pl.ANY),                     # W_ih^T  (load-once)
            pl.BlockSpec(memory_space=pl.ANY),                     # W_hh^T  (load-once)
            pl.BlockSpec(memory_space=pl.ANY),                     # b_ih+b_hh (load-once)
        ],
        out_specs=out_specs,
        scratch_shapes=[
            pltpu.VMEM((I, H_pad), w_ih_t.dtype),            # resident W_ih^T
            pltpu.VMEM((H_pad, H_pad), w_hh_t.dtype),        # resident W_hh^T
            pltpu.VMEM((1, H_pad), jnp.float32),             # resident bias (f32)
            pltpu.VMEM((t_blk, B_pad, H_pad), jnp.float32),  # xproj chunk (f32)
            pltpu.VMEM((B_pad, H_pad), jnp.float32),         # h carry (f32)
            pltpu.SemaphoreType.DMA((3,)),
        ],
        compiler_params=pltpu.CompilerParams(
            dimension_semantics=("arbitrary",),              # time is a recurrence
            vmem_limit_bytes=vmem_limit),
    )(x_tbi, w_ih_t, w_hh_t, bias)


# --------------------------------------------------------------------------
# Full forward (equivalent of RNN.forward)
# --------------------------------------------------------------------------
def rnn_model_forward(x_bti, params, *, t_blk=32, compute_dtype=jnp.float32):
    """Multi-layer tanh RNN, take r_out[:, -1, :], sigmoid.

    x_bti: (B, T, input_size), batch_first like the PyTorch module.
    compute_dtype: MXU operand dtype for weights/activations (f32 or bf16);
    accumulation, bias add, tanh/sigmoid and the h carry stay f32 either way.
    """
    B, T, _ = x_bti.shape
    t_blk = math.gcd(min(t_blk, T), T)               # keep T % t_blk == 0
    B_pad = _round_up(B, _SUBLANE)

    # Time-major, batch padded to a sublane multiple.
    h = jnp.transpose(x_bti, (1, 0, 2))
    h = jnp.pad(h, ((0, 0), (0, B_pad - B), (0, 0))).astype(compute_dtype)

    n_layers = len(params)
    H_last = params[-1]["w_hh_t"].shape[0]
    for li, p in enumerate(params):
        in_pad = h.shape[-1]                         # already lane-padded for li > 0
        H = p["w_hh_t"].shape[0]
        H_pad = _round_up(H, _LANE)
        w_ih = jnp.pad(p["w_ih_t"],
                       ((0, in_pad - p["w_ih_t"].shape[0]), (0, H_pad - H)))
        w_hh = jnp.pad(p["w_hh_t"], ((0, H_pad - H), (0, H_pad - H)))
        b = jnp.pad(p["b"], ((0, 0), (0, H_pad - H))).astype(jnp.float32)
        is_last = li == n_layers - 1
        out_dtype = jnp.float32 if is_last else compute_dtype
        h = rnn_layer_pallas(h, w_ih.astype(compute_dtype),
                             w_hh.astype(compute_dtype), b,
                             t_blk=t_blk, is_last=is_last, out_dtype=out_dtype)
    # TODO(synk): v7x — batch-tiled "parallel" grid axis (2 TensorCores) and a
    # layer-wavefront single pallas_call to keep inter-layer activations in VMEM.
    return h[:B, :H_last]                            # drop padded rows / lanes


# --------------------------------------------------------------------------
# Deterministic parameter init (matches torch.nn.RNN shapes / U(-k, k) init)
# --------------------------------------------------------------------------
def init_rnn_params(key, input_size, hidden_size, num_layers):
    k = 1.0 / math.sqrt(hidden_size)
    params = []
    for layer in range(num_layers):
        in_sz = input_size if layer == 0 else hidden_size
        key, k1, k2, k3, k4 = jax.random.split(key, 5)
        w_ih = jax.random.uniform(k1, (hidden_size, in_sz), jnp.float32, -k, k)
        w_hh = jax.random.uniform(k2, (hidden_size, hidden_size), jnp.float32, -k, k)
        b_ih = jax.random.uniform(k3, (hidden_size,), jnp.float32, -k, k)
        b_hh = jax.random.uniform(k4, (hidden_size,), jnp.float32, -k, k)
        params.append({
            "w_ih_t": w_ih.T,              # (in_sz, H) so the kernel does x @ W^T
            "w_hh_t": w_hh.T,              # (H, H)
            "b": (b_ih + b_hh)[None],      # (1, H) — biases pre-summed
        })
    return params


# --------------------------------------------------------------------------
# Pure-JAX reference (for correctness check)
# --------------------------------------------------------------------------
def rnn_model_reference(x_bti, params):
    x = jnp.transpose(x_bti, (1, 0, 2)).astype(jnp.float32)   # (T, B, I)
    for p in params:
        B = x.shape[1]
        H = p["w_hh_t"].shape[1]

        def step(h, x_t):
            h_new = jnp.tanh(x_t @ p["w_ih_t"] + p["b"] + h @ p["w_hh_t"])
            return h_new, h_new

        _, x = jax.lax.scan(step, jnp.zeros((B, H), jnp.float32), x)
    return jax.nn.sigmoid(x[-1])


# --------------------------------------------------------------------------
if __name__ == "__main__":
    B, T = 2, 8
    input_size, hidden_size, num_layers = 16, 32, 2
    output_size = hidden_size  # the module never uses output_size in forward

    key = jax.random.PRNGKey(0)
    key, kx, kp = jax.random.split(key, 3)
    x = jax.random.normal(kx, (B, T, input_size), dtype=jnp.float32)
    params = init_rnn_params(kp, input_size, hidden_size, num_layers)

    ref = jax.block_until_ready(rnn_model_reference(x, params))

    # f32 path: t_blk=4 -> grid=(2,) exercises the h carry across grid steps
    # and the load-once weight path.
    out = jax.block_until_ready(rnn_model_forward(x, params, t_blk=4))
    np.testing.assert_allclose(np.asarray(out), np.asarray(ref), atol=1e-5, rtol=1e-5)
    assert out.shape == (B, hidden_size)

    # bf16 operand path (f32 accumulate + f32 h carry): loose check vs f32 ref.
    out_bf16 = jax.block_until_ready(
        rnn_model_forward(x, params, t_blk=4, compute_dtype=jnp.bfloat16))
    np.testing.assert_allclose(np.asarray(out_bf16, dtype=np.float32),
                               np.asarray(ref), atol=5e-2, rtol=5e-2)

    print("KERNEL_OK")
</pallas_src>

<mosaic_0001>
module attributes {stable_mosaic.version = 11 : i64} {
  func.func @rnn_layer_kernel(%arg0: i32, %arg1: memref<4x8x16xf32, #tpu.memory_space<vmem>>, %arg2: memref<16x128xf32, #tpu.memory_space<any>>, %arg3: memref<128x128xf32, #tpu.memory_space<any>>, %arg4: memref<1x128xf32, #tpu.memory_space<any>>, %arg5: memref<4x8x128xf32, #tpu.memory_space<vmem>>, %arg6: memref<16x128xf32, #tpu.memory_space<vmem>>, %arg7: memref<128x128xf32, #tpu.memory_space<vmem>>, %arg8: memref<1x128xf32, #tpu.memory_space<vmem>>, %arg9: memref<4x8x128xf32, #tpu.memory_space<vmem>>, %arg10: memref<8x128xf32, #tpu.memory_space<vmem>>, %arg11: memref<3x!tpu.dma_semaphore, #tpu.memory_space<semaphore_mem>>) attributes {dimension_semantics = [#tpu.dimension_semantics<arbitrary>], iteration_bounds = array<i64: 2>, scalar_prefetch = 0 : i64, scratch_operands = 6 : i64, tpu.core_type = #tpu.core_type<tc>, window_params = [{transform_indices = @transform_0, window_bounds = array<i64: 4, 8, 16>}, {}, {}, {}, {transform_indices = @transform_4, window_bounds = array<i64: 4, 8, 128>}]} {
    %c0_i32 = arith.constant 0 : i32
    %0 = arith.cmpi eq, %arg0, %c0_i32 : i32
    %1 = arith.extui %0 : i1 to i32
    %c0_i32_0 = arith.constant 0 : i32
    %2 = arith.cmpi ne, %1, %c0_i32_0 : i32
    scf.if %2 {
      %c0_i32_43 = arith.constant 0 : i32
      %57 = tpu.memref_slice %arg11[%c0_i32_43] : memref<3x!tpu.dma_semaphore, #tpu.memory_space<semaphore_mem>> -> memref<1x!tpu.dma_semaphore, #tpu.memory_space<semaphore_mem>>
      %58 = tpu.memref_squeeze %57 : memref<1x!tpu.dma_semaphore, #tpu.memory_space<semaphore_mem>> -> memref<!tpu.dma_semaphore, #tpu.memory_space<semaphore_mem>>
      tpu.enqueue_dma source(%arg2 : memref<16x128xf32, #tpu.memory_space<any>>) target(%arg6 : memref<16x128xf32, #tpu.memory_space<vmem>>) target_semaphore(%58 : memref<!tpu.dma_semaphore, #tpu.memory_space<semaphore_mem>>)
      %c1_i32_44 = arith.constant 1 : i32
      %59 = tpu.memref_slice %arg11[%c1_i32_44] : memref<3x!tpu.dma_semaphore, #tpu.memory_space<semaphore_mem>> -> memref<1x!tpu.dma_semaphore, #tpu.memory_space<semaphore_mem>>
      %60 = tpu.memref_squeeze %59 : memref<1x!tpu.dma_semaphore, #tpu.memory_space<semaphore_mem>> -> memref<!tpu.dma_semaphore, #tpu.memory_space<semaphore_mem>>
      tpu.enqueue_dma source(%arg3 : memref<128x128xf32, #tpu.memory_space<any>>) target(%arg7 : memref<128x128xf32, #tpu.memory_space<vmem>>) target_semaphore(%60 : memref<!tpu.dma_semaphore, #tpu.memory_space<semaphore_mem>>)
      %c2_i32_45 = arith.constant 2 : i32
      %61 = tpu.memref_slice %arg11[%c2_i32_45] : memref<3x!tpu.dma_semaphore, #tpu.memory_space<semaphore_mem>> -> memref<1x!tpu.dma_semaphore, #tpu.memory_space<semaphore_mem>>
      %62 = tpu.memref_squeeze %61 : memref<1x!tpu.dma_semaphore, #tpu.memory_space<semaphore_mem>> -> memref<!tpu.dma_semaphore, #tpu.memory_space<semaphore_mem>>
      tpu.enqueue_dma source(%arg4 : memref<1x128xf32, #tpu.memory_space<any>>) target(%arg8 : memref<1x128xf32, #tpu.memory_space<vmem>>) target_semaphore(%62 : memref<!tpu.dma_semaphore, #tpu.memory_space<semaphore_mem>>)
      %c0_i32_46 = arith.constant 0 : i32
      %63 = tpu.memref_slice %arg11[%c0_i32_46] : memref<3x!tpu.dma_semaphore, #tpu.memory_space<semaphore_mem>> -> memref<1x!tpu.dma_semaphore, #tpu.memory_space<semaphore_mem>>
      %64 = tpu.memref_squeeze %63 : memref<1x!tpu.dma_semaphore, #tpu.memory_space<semaphore_mem>> -> memref<!tpu.dma_semaphore, #tpu.memory_space<semaphore_mem>>
      tpu.wait_dma2 semaphore(%64 : memref<!tpu.dma_semaphore, #tpu.memory_space<semaphore_mem>>) src(%arg2 : memref<16x128xf32, #tpu.memory_space<any>>) dst(%arg6 : memref<16x128xf32, #tpu.memory_space<vmem>>)
      %c1_i32_47 = arith.constant 1 : i32
      %65 = tpu.memref_slice %arg11[%c1_i32_47] : memref<3x!tpu.dma_semaphore, #tpu.memory_space<semaphore_mem>> -> memref<1x!tpu.dma_semaphore, #tpu.memory_space<semaphore_mem>>
      %66 = tpu.memref_squeeze %65 : memref<1x!tpu.dma_semaphore, #tpu.memory_space<semaphore_mem>> -> memref<!tpu.dma_semaphore, #tpu.memory_space<semaphore_mem>>
      tpu.wait_dma2 semaphore(%66 : memref<!tpu.dma_semaphore, #tpu.memory_space<semaphore_mem>>) src(%arg3 : memref<128x128xf32, #tpu.memory_space<any>>) dst(%arg7 : memref<128x128xf32, #tpu.memory_space<vmem>>)
      %c2_i32_48 = arith.constant 2 : i32
      %67 = tpu.memref_slice %arg11[%c2_i32_48] : memref<3x!tpu.dma_semaphore, #tpu.memory_space<semaphore_mem>> -> memref<1x!tpu.dma_semaphore, #tpu.memory_space<semaphore_mem>>
      %68 = tpu.memref_squeeze %67 : memref<1x!tpu.dma_semaphore, #tpu.memory_space<semaphore_mem>> -> memref<!tpu.dma_semaphore, #tpu.memory_space<semaphore_mem>>
      tpu.wait_dma2 semaphore(%68 : memref<!tpu.dma_semaphore, #tpu.memory_space<semaphore_mem>>) src(%arg4 : memref<1x128xf32, #tpu.memory_space<any>>) dst(%arg8 : memref<1x128xf32, #tpu.memory_space<vmem>>)
      %cst_49 = arith.constant 0.000000e+00 : f32
      %69 = vector.broadcast %cst_49 : f32 to vector<8x128xf32>
      %c0_50 = arith.constant 0 : index
      %c0_51 = arith.constant 0 : index
      %70 = vector.load %arg10[%c0_50, %c0_51] : memref<8x128xf32, #tpu.memory_space<vmem>>, vector<8x128xf32>
      tpu.vector_store %arg10[%c0_50, %c0_51], %69 {strides = array<i32>} : memref<8x128xf32, #tpu.memory_space<vmem>>, vector<8x128xf32>,
    } else {
    }
    %c0 = arith.constant 0 : index
    %c0_1 = arith.constant 0 : index
    %c0_2 = arith.constant 0 : index
    %3 = vector.load %arg1[%c0, %c0_1, %c0_2] : memref<4x8x16xf32, #tpu.memory_space<vmem>>, vector<4x8x16xf32>
    %c0_3 = arith.constant 0 : index
    %c0_4 = arith.constant 0 : index
    %4 = vector.load %arg6[%c0_3, %c0_4] : memref<16x128xf32, #tpu.memory_space<vmem>>, vector<16x128xf32>
    "tpu.trace_start"() <{level = 10 : i32, message = "tbi,ih->tbh"}> : () -> ()
    %cst = arith.constant dense<0.000000e+00> : vector<4x8x128xf32>
    %5 = tpu.matmul %3, %4, %cst {dimension_numbers = #tpu.dot_dimension_numbers<[2], [0], [0, 1], [1], [0, 0, 0, 1, 1, 1], [], []>} : vector<4x8x16xf32>, vector<16x128xf32>, vector<4x8x128xf32> -> vector<4x8x128xf32>
    "tpu.trace_stop"() : () -> ()
    %c0_5 = arith.constant 0 : index
    %c0_6 = arith.constant 0 : index
    %6 = vector.load %arg8[%c0_5, %c0_6] : memref<1x128xf32, #tpu.memory_space<vmem>>, vector<1x128xf32>
    %7 = vector.shape_cast %6 : vector<1x128xf32> to vector<1x1x128xf32>
    %8 = vector.broadcast %7 : vector<1x1x128xf32> to vector<4x8x128xf32>
    %9 = arith.addf %5, %8 : vector<4x8x128xf32>
    %c0_7 = arith.constant 0 : index
    %c0_8 = arith.constant 0 : index
    %c0_9 = arith.constant 0 : index
    %10 = vector.load %arg9[%c0_7, %c0_8, %c0_9] : memref<4x8x128xf32, #tpu.memory_space<vmem>>, vector<4x8x128xf32>
    tpu.vector_store %arg9[%c0_7, %c0_8, %c0_9], %9 {strides = array<i32>} : memref<4x8x128xf32, #tpu.memory_space<vmem>>, vector<4x8x128xf32>,
    %c0_10 = arith.constant 0 : index
    %c0_11 = arith.constant 0 : index
    %11 = vector.load %arg10[%c0_10, %c0_11] : memref<8x128xf32, #tpu.memory_space<vmem>>, vector<8x128xf32>
    %c0_i32_12 = arith.constant 0 : i32
    %c0_13 = arith.constant 0 : index
    %c0_14 = arith.constant 0 : index
    %12 = vector.load %arg7[%c0_13, %c0_14] : memref<128x128xf32, #tpu.memory_space<vmem>>, vector<128x128xf32>
    %cst_15 = arith.constant dense<0.000000e+00> : vector<8x128xf32>
    %13 = tpu.matmul %11, %12, %cst_15 {dimension_numbers = #tpu.dot_dimension_numbers<[1], [0], [0], [1], [0, 0, 1, 1], [], []>} : vector<8x128xf32>, vector<128x128xf32>, vector<8x128xf32> -> vector<8x128xf32>
    %14 = arith.index_cast %c0_i32_12 : i32 to index
    %c0_16 = arith.constant 0 : index
    %c0_17 = arith.constant 0 : index
    %15 = vector.load %arg9[%14, %c0_16, %c0_17] : memref<4x8x128xf32, #tpu.memory_space<vmem>>, vector<1x8x128xf32>
    %16 = vector.shape_cast %15 : vector<1x8x128xf32> to vector<8x128xf32>
    %17 = arith.addf %16, %13 : vector<8x128xf32>
    %18 = math.tanh %17 : vector<8x128xf32>
    %19 = arith.index_cast %c0_i32_12 : i32 to index
    %c0_18 = arith.constant 0 : index
    %c0_19 = arith.constant 0 : index
    %20 = vector.load %arg5[%19, %c0_18, %c0_19] : memref<4x8x128xf32, #tpu.memory_space<vmem>>, vector<1x8x128xf32>
    %21 = vector.shape_cast %20 : vector<1x8x128xf32> to vector<8x128xf32>
    %22 = vector.shape_cast %18 : vector<8x128xf32> to vector<1x8x128xf32>
    tpu.vector_store %arg5[%19, %c0_18, %c0_19], %22 {strides = array<i32>} : memref<4x8x128xf32, #tpu.memory_space<vmem>>, vector<1x8x128xf32>,
    %c1_i32 = arith.constant 1 : i32
    %c0_20 = arith.constant 0 : index
    %c0_21 = arith.constant 0 : index
    %23 = vector.load %arg7[%c0_20, %c0_21] : memref<128x128xf32, #tpu.memory_space<vmem>>, vector<128x128xf32>
    %cst_22 = arith.constant dense<0.000000e+00> : vector<8x128xf32>
    %24 = tpu.matmul %18, %23, %cst_22 {dimension_numbers = #tpu.dot_dimension_numbers<[1], [0], [0], [1], [0, 0, 1, 1], [], []>} : vector<8x128xf32>, vector<128x128xf32>, vector<8x128xf32> -> vector<8x128xf32>
    %25 = arith.index_cast %c1_i32 : i32 to index
    %c0_23 = arith.constant 0 : index
    %c0_24 = arith.constant 0 : index
    %26 = vector.load %arg9[%25, %c0_23, %c0_24] : memref<4x8x128xf32, #tpu.memory_space<vmem>>, vector<1x8x128xf32>
    %27 = vector.shape_cast %26 : vector<1x8x128xf32> to vector<8x128xf32>
    %28 = arith.addf %27, %24 : vector<8x128xf32>
    %29 = math.tanh %28 : vector<8x128xf32>
    %30 = arith.index_cast %c1_i32 : i32 to index
    %c0_25 = arith.constant 0 : index
    %c0_26 = arith.constant 0 : index
    %31 = vector.load %arg5[%30, %c0_25, %c0_26] : memref<4x8x128xf32, #tpu.memory_space<vmem>>, vector<1x8x128xf32>
    %32 = vector.shape_cast %31 : vector<1x8x128xf32> to vector<8x128xf32>
    %33 = vector.shape_cast %29 : vector<8x128xf32> to vector<1x8x128xf32>
    tpu.vector_store %arg5[%30, %c0_25, %c0_26], %33 {strides = array<i32>} : memref<4x8x128xf32, #tpu.memory_space<vmem>>, vector<1x8x128xf32>,
    %c2_i32 = arith.constant 2 : i32
    %c0_27 = arith.constant 0 : index
    %c0_28 = arith.constant 0 : index
    %34 = vector.load %arg7[%c0_27, %c0_28] : memref<128x128xf32, #tpu.memory_space<vmem>>, vector<128x128xf32>
    %cst_29 = arith.constant dense<0.000000e+00> : vector<8x128xf32>
    %35 = tpu.matmul %29, %34, %cst_29 {dimension_numbers = #tpu.dot_dimension_numbers<[1], [0], [0], [1], [0, 0, 1, 1], [], []>} : vector<8x128xf32>, vector<128x128xf32>, vector<8x128xf32> -> vector<8x128xf32>
    %36 = arith.index_cast %c2_i32 : i32 to index
    %c0_30 = arith.constant 0 : index
    %c0_31 = arith.constant 0 : index
    %37 = vector.load %arg9[%36, %c0_30, %c0_31] : memref<4x8x128xf32, #tpu.memory_space<vmem>>, vector<1x8x128xf32>
    %38 = vector.shape_cast %37 : vector<1x8x128xf32> to vector<8x128xf32>
    %39 = arith.addf %38, %35 : vector<8x128xf32>
    %40 = math.tanh %39 : vector<8x128xf32>
    %41 = arith.index_cast %c2_i32 : i32 to index
    %c0_32 = arith.constant 0 : index
    %c0_33 = arith.constant 0 : index
    %42 = vector.load %arg5[%41, %c0_32, %c0_33] : memref<4x8x128xf32, #tpu.memory_space<vmem>>, vector<1x8x128xf32>
    %43 = vector.shape_cast %42 : vector<1x8x128xf32> to vector<8x128xf32>
    %44 = vector.shape_cast %40 : vector<8x128xf32> to vector<1x8x128xf32>
    tpu.vector_store %arg5[%41, %c0_32, %c0_33], %44 {strides = array<i32>} : memref<4x8x128xf32, #tpu.memory_space<vmem>>, vector<1x8x128xf32>,
    %c3_i32 = arith.constant 3 : i32
    %c0_34 = arith.constant 0 : index
    %c0_35 = arith.constant 0 : index
    %45 = vector.load %arg7[%c0_34, %c0_35] : memref<128x128xf32, #tpu.memory_space<vmem>>, vector<128x128xf32>
    %cst_36 = arith.constant dense<0.000000e+00> : vector<8x128xf32>
    %46 = tpu.matmul %40, %45, %cst_36 {dimension_numbers = #tpu.dot_dimension_numbers<[1], [0], [0], [1], [0, 0, 1, 1], [], []>} : vector<8x128xf32>, vector<128x128xf32>, vector<8x128xf32> -> vector<8x128xf32>
    %47 = arith.index_cast %c3_i32 : i32 to index
    %c0_37 = arith.constant 0 : index
    %c0_38 = arith.constant 0 : index
    %48 = vector.load %arg9[%47, %c0_37, %c0_38] : memref<4x8x128xf32, #tpu.memory_space<vmem>>, vector<1x8x128xf32>
    %49 = vector.shape_cast %48 : vector<1x8x128xf32> to vector<8x128xf32>
    %50 = arith.addf %49, %46 : vector<8x128xf32>
    %51 = math.tanh %50 : vector<8x128xf32>
    %52 = arith.index_cast %c3_i32 : i32 to index
    %c0_39 = arith.constant 0 : index
    %c0_40 = arith.constant 0 : index
    %53 = vector.load %arg5[%52, %c0_39, %c0_40] : memref<4x8x128xf32, #tpu.memory_space<vmem>>, vector<1x8x128xf32>
    %54 = vector.shape_cast %53 : vector<1x8x128xf32> to vector<8x128xf32>
    %55 = vector.shape_cast %51 : vector<8x128xf32> to vector<1x8x128xf32>
    tpu.vector_store %arg5[%52, %c0_39, %c0_40], %55 {strides = array<i32>} : memref<4x8x128xf32, #tpu.memory_space<vmem>>, vector<1x8x128xf32>,
    %c4_i32 = arith.constant 4 : i32
    %c0_41 = arith.constant 0 : index
    %c0_42 = arith.constant 0 : index
    %56 = vector.load %arg10[%c0_41, %c0_42] : memref<8x128xf32, #tpu.memory_space<vmem>>, vector<8x128xf32>
    tpu.vector_store %arg10[%c0_41, %c0_42], %51 {strides = array<i32>} : memref<8x128xf32, #tpu.memory_space<vmem>>, vector<8x128xf32>,
    return
  }
  func.func @transform_0(%arg0: i32) -> (i32, i32, i32) {
    %c0_i32 = arith.constant 0 : i32
    %c0_i32_0 = arith.constant 0 : i32
    %c0_i32_1 = arith.constant 0 : i32
    return %arg0, %c0_i32, %c0_i32_0 : i32, i32, i32
  }
  func.func @transform_4(%arg0: i32) -> (i32, i32, i32) {
    %c0_i32 = arith.constant 0 : i32
    %c0_i32_0 = arith.constant 0 : i32
    %c0_i32_1 = arith.constant 0 : i32
    return %arg0, %c0_i32, %c0_i32_0 : i32, i32, i32
  }
}

</mosaic_0001>

<bundles_post_ra>
// kernel: tpu_custom_call.1
= control target key start
LH: loop header
LB: loop body
LE: loop exit
PB: predicated region body
PF: predicated region fallthrough
CT: control target
= control target key end

     0   :  { %9 = vsyncpa [#allocation9], 0  ;;  %s1712_s0 = inlined_call_operand.hbm [shape: f32[8,8,16], index: 0, kind: input, shape index: {}]   ;;  %s1713_s1 = inlined_call_operand.hbm [shape: f32[16,128], index: 1, kind: input, shape index: {}]   ;;  %s1714_s2 = inlined_call_operand.hbm [shape: f32[128,128], index: 2, kind: input, shape index: {}]   ;;  %s1715_s3 = inlined_call_operand.vmem [shape: f32[1,128], index: 3, kind: input, shape index: {}]   ;;  %s1716_s4 = inlined_call_operand.hbm [shape: f32[8,8,128], index: 4, kind: output, shape index: {}]  }
   0x1   :  { %11 = vsyncpa [#allocation9 + $0x1], 0 }
   0x2   :  { %12 = vsyncpa [#allocation10], 0 }
   0x3   :  { %14 = vsyncpa [#allocation10 + $0x1], 0  ;;  %s1423_s15 = smov 0   ;;  %s1425_s16 = smov 0  }
   0x4   :  { %s1427_s17 = smov 0   ;;  %s1429_s18 = smov 0  }
   0x5 LB: > { %s1444_s19 = sadd.s32 4294967295, %s1384_s18   ;;  %s822_s20 = sadd.s32 4294967294, %s1384_s18   ;;  %s1384_s18 = sphi %s1429_s18, %s1729_s18   ;;  %s1380_s17 = sphi %s1427_s17, %s1728_s17   ;;  %s1376_s16 = sphi %s1425_s16, %s1727_s16   ;;  %s1372_s15 = sphi %s1423_s15, %s1726_s15  }
   0x6   : > { %s1448_s21 = sadd.s32 1, %s1384_s18   ;;  %s27_s22 = sadd.s32 1, %s1380_s17 }
   0x7   : > { %s24_s23 = ssub.s32 %s1384_s18, %s1448_s21  ;;  %p34_p0 = scmp.ne.s32.totalorder %s1380_s17, %s1376_s16 }
   0x8   : > { %p25_p1 = scmp.eq.s32.totalorder %s24_s23, 0  ;;  %p35_p2 = scmp.eq.s32.totalorder %s1384_s18, 0 }
   0x9   : > { %p40_p3 = scmp.ne.s32.totalorder %s1376_s16, %s1372_s15  ;;  %p41_p4 = scmp.eq.s32.totalorder %s1444_s19, 0 }
   0xa   : > { %s1460_s24 = scalar_select %p25_p1, %s1380_s17, %s27_s22  }
   0xb   : > { %p1462_p5 = por %p35_p2, %p34_p0  ;;  %p1466_p6 = por %p41_p4, %p40_p3 }
   0xc   : > { %p64_p7 = scmp.eq.s32.totalorder %s1444_s19, 1  ;;  %p70_p8 = scmp.eq.s32.totalorder %s822_s20, 1 }
   0xd   : > { %p1186_p10 = scmp.lt.s32.totalorder %s1384_s18, 2  ;;  %s90_s29 = sand.u32 1, %s1380_s17  }
   0xe   : > { %p1473_p11 = por %p64_p7, %p34_p0  ;;  %p1477_p12 = por %p70_p8, %p40_p3 }
   0xf   : > { %s848_s30 = sshll.u32 %s1384_s18, 9  ;;  %s825_s5 = sshll.u32 %s90_s29, 5 }
  0x10   : > { %s1720_s27 = scalar_select %p1473_p11, 1, 0 }
  0x11   : > { %s1721_s28 = scalar_select %p1477_p12, 1, 0 }
  0x12   : > { %s1486_s8 = scalar_lea.hbm %s1712_s0, %s848_s30  ;;  %s94_s9 = scalar_lea.vmem [#allocation8], %s825_s5 }
  0x13   : > { %s101_s10 = sshll.u32 %s94_s9, 4  ;;  %p1490_p13 = pnand %p1186_p10, %p1462_p5  ;;  %s1494_s10 = int_to_ptr.vmem [resolvable:$true] %s101_s10 }
  0x14   : > { %s1496_s12 = scalar_lea.sflag [#allocation9], %s90_s29  ;;  %s1238_s13 = scalar_lea.hbm %s1486_s8, 512 }
  0x15   : > { %p1239_p0 = scmp.ne.s32.totalorder %s1486_s8, %s1238_s13  ;;  %p1240_p1 = pneg %p1490_p13 }
  0x16   : > { %s1243_s22 = scalar_lea.hbm %s1712_s0, 1024  ;;  %p1244_p4 = scmp.lt.u32.totalorder %s1486_s8, %s1712_s0 }
  0x17   : > { %p1241_p2 = pnand %p1240_p1, %p1239_p0  ;;  %p1245_p5 = scmp.lt.u32.totalorder %s1243_s22, %s1238_s13 }
  0x18   : > { %p1247_p8 = scmp.lt.u32.totalorder %s1238_s13, %s1486_s8 }
  0x19   : > { %p1242_p3 = pneg %p1241_p2  ;;  %p1246_p7 = por %p1245_p5, %p1244_p4 }
  0x1b   : > { %p1248_p10 = por %p1247_p8, %p1246_p7 }
  0x1d   : > { %p1249_p9 = pnand %p1248_p10, %p1242_p3 }
  0x1f   : > { %1252 = shalt.err (!%p1249_p9)
}
  0x20   : > { %s1253_s29 = scalar_lea.vmem %s1494_s10, 512  ;;  %s1386_s30 = smov [#allocation8]  }
  0x21   : > { %p1254_p0 = scmp.ne.s32.totalorder %s1494_s10, %s1253_s29  ;;  %s1258_s5 = sshll.u32 %s1386_s30, 4  ;;  %s1259_s5 = int_to_ptr.vmem [resolvable:$false] %s1258_s5 }
  0x22   : > { %s1260_s6 = scalar_lea.vmem %s1259_s5, 1024  ;;  %p1261_p11 = scmp.lt.s32.totalorder %s1494_s10, %s1259_s5 }
  0x23   : > { %p1256_p2 = pnand %p1254_p0, %p1240_p1  ;;  %p1262_p4 = scmp.lt.s32.totalorder %s1260_s6, %s1253_s29 }
  0x25   : > { %p1257_p12 = pneg %p1256_p2  ;;  %p1263_p5 = por %p1262_p4, %p1261_p11 }
  0x27   : > { %p1264_p7 = pnand %p1263_p5, %p1257_p12 }
  0x29   : > { %1267 = shalt.err (!%p1264_p7)
}
  0x2a   : > { %s1387_s7 = smov 128   ;;  %s1388_s9 = smov 8  }
  0x2b   : > { %1181 = dma.hbm_to_vmem [thread:$0]  (!%p1490_p13), %s1486_s8, 512, %s1494_s10, %s1496_s12, %s1387_s7, %s1387_s7, %s1388_s9  }
  0x2c   : > { %p828_p9 = scmp.ge.s32.totalorder %s1384_s18, 1  ;;  %p109_p1 = scmp.lt.s32.totalorder %s1384_s18, 3 }
  0x2e   : > { %p110_p3 = pnand %p828_p9, %p109_p1 }
  0x2f   : > { %s1527_s13 = sand.u32 (!%p110_p3), 1, %s1376_s16  }
  0x30   : > { %113 = sbr.rel (%p110_p3) target bundleno = 1047 (0x417), region = 24  ;;  %s829_s14 = sshll.u32 (!%p110_p3), %s1527_s13, 5 }
  0x31   : > { %s116_s20 = scalar_lea.sflag (!%p110_p3), [#allocation9], %s1527_s13  ;;  %s1531_s22 = scalar_lea.vmem (!%p110_p3), [#allocation8], %s829_s14 }
  0x37   : > { %1357 = dma.done.wait (%p1466_p6), %s116_s20, 512  }
  0x38   : > { %1359 = vsyncadd (%p1466_p6), %s116_s20, 4294966784  ;;  %s1537_s8 = scalar_lea.vmem [#allocation11], %s829_s14  ;;  %p831_p11 = scmp.ne.s32.totalorder %s1444_s19, 0 }
  0x39   : > { %v185_v0 = vld [vmem:[%s1715_s3] sm:$0x1] (!%p831_p11)  ;;  %s1389_s12 = smov (!%p831_p11), [#allocation2]   ;;  %s1390_s25 = smov (!%p831_p11), [#allocation3]  }
  0x3a   : > { %143 = sbr.rel (%p831_p11) target bundleno = 98 (0x62), region = 32  ;;  %s151_s23 = sshll.u32 (!%p831_p11), %s1389_s12, 4  ;;  %186 = vst [vmem:[#allocation4] sm:$0x1] (!%p831_p11), %v185_v0  ;;  %s152_s23 = int_to_ptr.vmem [resolvable:$true] %s151_s23 }
  0x3b   : > { %s163_s29 = sshll.u32 (!%p831_p11), %s1390_s25, 4  ;;  %s1268_s26 = scalar_lea.hbm (!%p831_p11), %s1713_s1, 256  ;;  %s164_s29 = int_to_ptr.vmem [resolvable:$true] %s163_s29 }
  0x3c   : > { %p1269_p6 = scmp.ne.s32.totalorder (!%p831_p11), %s1713_s1, %s1268_s26  ;;  %p1272_p12 = scmp.lt.u32.totalorder (!%p831_p11), %s1268_s26, %s1713_s1 }
  0x3e   : > { %p1274_p13 = pnand (!%p831_p11), %p1272_p12, %p1269_p6 }
  0x41   : > { %1277 = shalt.err (!%p1274_p13)  }
  0x42   : > { %s1278_s20 = scalar_lea.vmem %s152_s23, 256  ;;  %p1283_p10 = scmp.lt.s32.totalorder %s152_s23, %s152_s23 }
  0x43   : > { %p1279_p8 = scmp.ne.s32.totalorder %s152_s23, %s1278_s20  ;;  %p1284_p0 = scmp.lt.s32.totalorder %s1278_s20, %s1278_s20 }
  0x45   : > { %p1285_p2 = por %p1284_p0, %p1283_p10 }
  0x47   : > { %p1286_p4 = pnand %p1285_p2, %p1279_p8 }
  0x49   : > { %1289 = shalt.err (!%p1286_p4)  }
  0x4a   : > { %154 = dma.hbm_to_vmem [thread:$0]  %s1713_s1, 256, %s152_s23, [#allocation7] }
  0x4b   : > { %s1290_s30 = scalar_lea.hbm %s1714_s2, 2048 }
  0x4c   : > { %p1291_p5 = scmp.ne.s32.totalorder %s1714_s2, %s1290_s30  ;;  %p1294_p7 = scmp.lt.u32.totalorder %s1290_s30, %s1714_s2 }
  0x4e   : > { %p1296_p9 = pnand %p1294_p7, %p1291_p5 }
  0x50   : > { %1299 = shalt.err (!%p1296_p9)  }
  0x51   : > { %s1300_s9 = scalar_lea.vmem %s164_s29, 2048  ;;  %p1305_p3 = scmp.lt.s32.totalorder %s164_s29, %s164_s29 }
  0x52   : > { %p1301_p1 = scmp.ne.s32.totalorder %s164_s29, %s1300_s9  ;;  %p1306_p11 = scmp.lt.s32.totalorder %s1300_s9, %s1300_s9 }
  0x54   : > { %p1307_p6 = por %p1306_p11, %p1305_p3 }
  0x56   : > { %p1308_p12 = pnand %p1307_p6, %p1301_p1 }
  0x58   : > { %1311 = shalt.err (!%p1308_p12)  }
  0x59   : > { %166 = dma.hbm_to_vmem [thread:$0]  %s1714_s2, 2048, %s164_s29, [#allocation7 + $0x1] }
  0x5a   : > { %211 = vsyncadd [#allocation7 + $0x2], 16 }
  0x5b   : > { %1360 = dma.done.wait [#allocation7], 256 }
  0x5c   : > { %1361 = vsyncadd [#allocation7], 4294967040 }
  0x5d   : > { %1362 = dma.done.wait [#allocation7 + $0x1], 2048 }
  0x5e   : > { %1363 = vsyncadd [#allocation7 + $0x1], 4294965248 }
  0x5f   : > { %1364 = dma.done.wait [#allocation7 + $0x2], 16 }
  0x60   : > { %1365 = vsyncadd [#allocation7 + $0x2], 4294967280  ;;  %v1391_v1 = vmov 0.0  }
  0x61   : > { %221 = vst [vmem:[#allocation6] sm:$0xff] %v1391_v1 }
  0x62 PF: > { %v338_v2 = vld [vmem:[#allocation3] sm:$0xff]  ;;  %v339_v3 = vld [vmem:[#allocation3 + $0x8] sm:$0xff]  ;;  %v340_v4 = vld [vmem:[#allocation3 + $0x10] sm:$0xff]  ;;  %v1392_v5 = vmov 0.0|0.0   ;;  %vm1393_vm0 = vmmov 0   ;;  %v1394_v8 = vmov 0.0  }
  0x63   : > { %1078 = vmatprep.subr.bf16.mxu1 %v1392_v5  ;;  %v1568_v6 = vpack.c.bf16 %v339_v3, %v338_v2  ;;  %v341_v7 = vld [vmem:[#allocation3 + $0x18] sm:$0xff]  ;;  %966 = vmatprep.mubr.msk.f32.mxu1 %vm1393_vm0, %v1394_v8  ;;  %v342_v10 = vld [vmem:[#allocation3 + $0x20] sm:$0xff]  ;;  %vm235_vm1 = vcmask 130048   ;;  %v343_v11 = vld [vmem:[#allocation3 + $0x28] sm:$0xff]  ;;  %s719_s29 = sshll.u32 %s1537_s8, 4  ;;  %s706_s12 = scalar_lea.sflag [#allocation10], %s1527_s13  ;;  %s1667_s29 = int_to_ptr.vmem [resolvable:$true] %s719_s29 }
  0x64   : > { %v1573_v9 = vpack.c.bf16 %v341_v7, %v340_v4  ;;  %v226_v12 = vld [vmem:[#allocation2] sm:$0xff]  ;;  %v227_v13 = vld [vmem:[#allocation2 + $0x8] sm:$0xff]  ;;  %v1579_v16 = vpack.c.bf16 %v343_v11, %v342_v10  ;;  %v346_v21 = vld [vmem:[#allocation3 + $0x40] sm:$0xff]  ;;  %s1312_s25 = scalar_lea.vmem %s1667_s29, 512  ;;  %p1723_p8 = scmp.ne.s32.totalorder %s1720_s27, 0 }
  0x65   : > { %1080 = vmatpush3.bf16.msra.mxu1 %v1568_v6  ;;  %v1074_v14 = vpack.c.bf16 %v227_v13, %v226_v12  ;;  %v222_v15 = vld [vmem:[%s1531_s22] sm:$0xff]  ;;  %v345_v18 = vld [vmem:[#allocation3 + $0x38] sm:$0xff]  ;;  %v350_v27 = vld [vmem:[#allocation3 + $0x60] sm:$0xff]  ;;  %p1313_p13 = scmp.ne.s32.totalorder %s1667_s29, %s1312_s25 }
  0x66   : > { %1081 = vmatprep.subr.bf16.mxu1 %v1392_v5  ;;  %928 = vmatprep.mubr.msk.f32.mxu0 %vm235_vm1, %v222_v15  ;;  %v344_v17 = vld [vmem:[#allocation3 + $0x30] sm:$0xff]  ;;  %v347_v22 = vld [vmem:[#allocation3 + $0x48] sm:$0xff]  ;;  %v349_v25 = vld [vmem:[#allocation3 + $0x58] sm:$0xff] }
  0x67   : > { %1075 = vmatprep.subr.bf16.mxu0 %v1074_v14  ;;  %v223_v19 = vld [vmem:[%s1531_s22 + $0x8] sm:$0xff]  ;;  %v1585_v20 = vpack.c.bf16 %v345_v18, %v344_v17  ;;  %v1592_v23 = vpack.c.bf16 %v347_v22, %v346_v21  ;;  %v351_v28 = vld [vmem:[#allocation3 + $0x68] sm:$0xff]  ;;  %v224_v34 = vld [vmem:[%s1531_s22 + $0x10] sm:$0xff]  ;;  %p1314_p10 = pnand %p1313_p13, %p1723_p8 }
  0x68   : > { %1077 = vmatpush3.bf16.msra.mxu0 %v1074_v14  ;;  %v348_v24 = vld [vmem:[#allocation3 + $0x50] sm:$0xff]  ;;  %v1604_v29 = vpack.c.bf16 %v351_v28, %v350_v27  ;;  %v353_v31 = vld [vmem:[#allocation3 + $0x78] sm:$0xff]  ;;  %v337_v33 = vld [vmem:[#allocation6] sm:$0xff] }
  0x69   : > { %1083 = vmatpush3.bf16.msra.mxu1 %v1573_v9  ;;  %1102 = vmatprep.subr.bf16.mxu0 %v1392_v5  ;;  %v1598_v26 = vpack.c.bf16 %v349_v25, %v348_v24  ;;  %v352_v30 = vld [vmem:[#allocation3 + $0x70] sm:$0xff]  ;;  %v225_v35 = vld [vmem:[%s1531_s22 + $0x18] sm:$0xff]  ;;  %v832_v38 = vld [vmem:[#allocation4] ss:$0 sm:$0xff]  ;;  %s849_s22 = sshll.u32 %s1444_s19, 9  ;;  %p1315_p0 = pneg %p1314_p10 }
  0x6a   : > { %1084 = vmatprep.subr.bf16.mxu1 %v1392_v5  ;;  %v1100_v32 = vpack.c.bf16 %v353_v31, %v352_v30  ;;  %s1665_s11 = scalar_lea.hbm %s1716_s4, %s849_s22  ;;  %s1395_s19 = smov [#allocation11]  }
  0x6b   : > { %929 = vmatmul.mubr.msk.f32.vlgmr.msra.gmra.mrb[0].mxu0 %vm235_vm1, %v223_v19  ;;  %s1316_s30 = sshll.u32 %s1395_s19, 4  ;;  %s1317_s30 = int_to_ptr.vmem [resolvable:$false] %s1316_s30 }
  0x6c   : > { %1104 = vmatpush3.bf16.msra.mxu0 %v1568_v6  ;;  %931 = vmatprep.mubr.msk.f32.mxu0 %vm235_vm1, %v224_v34  ;;  %s1318_s5 = scalar_lea.vmem %s1317_s30, 1024  ;;  %p1319_p2 = scmp.lt.s32.totalorder %s1667_s29, %s1317_s30 }
  0x6d   : > { %1086 = vmatpush3.bf16.msra.mxu1 %v1579_v16  ;;  %1105 = vmatprep.subr.bf16.mxu0 %v1392_v5  ;;  %p1320_p4 = scmp.lt.s32.totalorder %s1318_s5, %s1312_s25 }
  0x6e   : > { %1087 = vmatprep.subr.bf16.mxu1 %v1392_v5 }
  0x6f   : > { %932 = vmatmul.mubr.msk.f32.gmra.mrb[2].mxu0 %vm235_vm1, %v225_v35  ;;  %p1321_p5 = por %p1320_p4, %p1319_p2 }
  0x70   : > { %1107 = vmatpush3.bf16.msra.mxu0 %v1573_v9  ;;  %1001 = vmatprep.mubr.msk.f32.mxu0 %vm1393_vm0, %v1394_v8 }
  0x71   : > { %1089 = vmatpush3.bf16.msra.mxu1 %v1585_v20  ;;  %1108 = vmatprep.subr.bf16.mxu0 %v1392_v5  ;;  %p1322_p7 = pnand %p1321_p5, %p1315_p0 }
  0x72   : > { %1090 = vmatprep.subr.bf16.mxu1 %v1392_v5 }
  0x74   : > { %1110 = vmatpush3.bf16.msra.mxu0 %v1579_v16 }
  0x75   : > { %1092 = vmatpush3.bf16.msra.mxu1 %v1592_v23  ;;  %1111 = vmatprep.subr.bf16.mxu0 %v1392_v5 }
  0x76   : > { %1093 = vmatprep.subr.bf16.mxu1 %v1392_v5 }
  0x78   : > { %1113 = vmatpush3.bf16.msra.mxu0 %v1585_v20 }
  0x79   : > { %1095 = vmatpush3.bf16.msra.mxu1 %v1598_v26  ;;  %1114 = vmatprep.subr.bf16.mxu0 %v1392_v5 }
  0x7a   : > { %1096 = vmatprep.subr.bf16.mxu1 %v1392_v5 }
  0x7c   : > { %1116 = vmatpush3.bf16.msra.mxu0 %v1592_v23 }
  0x7d   : > { %1098 = vmatpush3.bf16.msra.mxu1 %v1604_v29  ;;  %1117 = vmatprep.subr.bf16.mxu0 %v1392_v5 }
  0x7e   : > { %1099 = vmatprep.subr.bf16.mxu1 %v1392_v5 }
  0x80   : > { %1119 = vmatpush3.bf16.msra.mxu0 %v1598_v26 }
  0x81   : > { %1101 = vmatpush3.bf16.msra.mxu1 %v1100_v32  ;;  %1120 = vmatprep.subr.bf16.mxu0 %v1392_v5 }
  0x82   : > { %1126 = vmatprep.subr.bf16.mxu1 %v1392_v5 }
  0x84   : > { %967 = vmatmul.mubr.f32.vlgmr.msra.gmra.mrb[0].mxu1 %v337_v33  ;;  %1122 = vmatpush3.bf16.msra.mxu0 %v1604_v29 }
  0x85   : > { %1128 = vmatpush3.bf16.msra.mxu1 %v1568_v6  ;;  %1036 = vmatprep.mubr.msk.f32.mxu1 %vm1393_vm0, %v1394_v8 }
  0x86   : > { %1129 = vmatprep.subr.bf16.mxu1 %v1392_v5  ;;  %1123 = vmatprep.subr.bf16.mxu0 %v1392_v5 }
  0x88   : > { %1125 = vmatpush3.bf16.msra.mxu0 %v1100_v32 }
  0x89   : > { %1131 = vmatpush3.bf16.msra.mxu1 %v1573_v9  ;;  %1150 = vmatprep.subr.bf16.mxu0 %v1392_v5 }
  0x8a   : > { %1132 = vmatprep.subr.bf16.mxu1 %v1392_v5 }
  0x8d   : > { %1134 = vmatpush3.bf16.msra.mxu1 %v1579_v16 }
  0x8e   : > { %1135 = vmatprep.subr.bf16.mxu1 %v1392_v5 }
  0x91   : > { %1137 = vmatpush3.bf16.msra.mxu1 %v1585_v20 }
  0x92   : > { %1138 = vmatprep.subr.bf16.mxu1 %v1392_v5 }
  0x95   : > { %1140 = vmatpush3.bf16.msra.mxu1 %v1592_v23 }
  0x96   : > { %1141 = vmatprep.subr.bf16.mxu1 %v1392_v5 }
  0x99   : > { %1143 = vmatpush3.bf16.msra.mxu1 %v1598_v26 }
  0x9a   : > { %1144 = vmatprep.subr.bf16.mxu1 %v1392_v5 }
  0x9d   : > { %1146 = vmatpush3.bf16.msra.mxu1 %v1604_v29 }
  0x9e   : > { %1147 = vmatprep.subr.bf16.mxu1 %v1392_v5 }
  0xa1   : > { %1149 = vmatpush3.bf16.msra.mxu1 %v1100_v32 }
 0x13e   : > { %v930_v36 = vpop.f32.mrb[0].mxu0 }
 0x13f   : > { %v314_v37 = vpop.f32.mrb[1].mxu0  ;;  %v320_v46 = vadd.f32 %v930_v36, %v832_v38 }
 0x140   : > { %v315_v39 = vadd.f32 %v832_v38, %v314_v37 }
 0x142   : > { %v933_v44 = vpop.f32.mrb[2].mxu0 }
 0x143   : > { %v324_v45 = vpop.f32.mrb[3].mxu0  ;;  %v330_v56 = vadd.f32 %v933_v44, %v832_v38 }
 0x144   : > { %v325_v51 = vadd.f32 %v832_v38, %v324_v45 }
 0x157   : > { %v420_v40 = vpop.f32.mrb[0].mxu1 }
 0x158   : > { %v425_v41 = vadd.f32 %v420_v40, %v315_v39  ;;  %v968_v42 = vpop.f32.mrb[1].mxu1 }
 0x15a   : > { %1230 = vtanh.f32 %v425_v41 }
 0x164   : > { %v1231_v43 = vpop.eup %1230 }
 0x165   : > { %427 = vst [vmem:[%s1537_s8] sm:$0xff] %v1231_v43  ;;  %1002 = vmatmul.mubr.f32.vlgmr.msra.gmra.mrb[4].mxu0 %v1231_v43 }
 0x166   : > { %1152 = vmatpush3.bf16.msra.mxu0 %v1568_v6  ;;  %1071 = vmatprep.mubr.msk.f32.mxu0 %vm1393_vm0, %v1394_v8 }
 0x167   : > { %1153 = vmatprep.subr.bf16.mxu0 %v1392_v5 }
 0x16a   : > { %1155 = vmatpush3.bf16.msra.mxu0 %v1573_v9 }
 0x16b   : > { %1156 = vmatprep.subr.bf16.mxu0 %v1392_v5 }
 0x16e   : > { %1158 = vmatpush3.bf16.msra.mxu0 %v1579_v16 }
 0x16f   : > { %1159 = vmatprep.subr.bf16.mxu0 %v1392_v5 }
 0x172   : > { %1161 = vmatpush3.bf16.msra.mxu0 %v1585_v20 }
 0x173   : > { %1162 = vmatprep.subr.bf16.mxu0 %v1392_v5 }
 0x176   : > { %1164 = vmatpush3.bf16.msra.mxu0 %v1592_v23 }
 0x177   : > { %1165 = vmatprep.subr.bf16.mxu0 %v1392_v5 }
 0x17a   : > { %1167 = vmatpush3.bf16.msra.mxu0 %v1598_v26 }
 0x17b   : > { %1168 = vmatprep.subr.bf16.mxu0 %v1392_v5 }
 0x17e   : > { %1170 = vmatpush3.bf16.msra.mxu0 %v1604_v29 }
 0x17f   : > { %1171 = vmatprep.subr.bf16.mxu0 %v1392_v5 }
 0x182   : > { %1173 = vmatpush3.bf16.msra.mxu0 %v1100_v32 }
 0x238   : > { %v510_v47 = vpop.f32.mrb[4].mxu0 }
 0x239   : > { %v516_v48 = vadd.f32 %v510_v47, %v320_v46  ;;  %v1003_v49 = vpop.f32.mrb[5].mxu0 }
 0x23b   : > { %1232 = vtanh.f32 %v516_v48 }
 0x245   : > { %v1233_v50 = vpop.eup %1232 }
 0x246   : > { %837 = vst [vmem:[%s1537_s8 + $0x8] sm:$0xff] %v1233_v50  ;;  %1037 = vmatmul.mubr.f32.vlgmr.msra.gmra.mrb[2].mxu1 %v1233_v50 }
 0x319   : > { %v602_v52 = vpop.f32.mrb[2].mxu1 }
 0x31a   : > { %v608_v53 = vadd.f32 %v602_v52, %v325_v51  ;;  %v1038_v54 = vpop.f32.mrb[3].mxu1 }
 0x31c   : > { %1234 = vtanh.f32 %v608_v53 }
 0x326   : > { %v1235_v55 = vpop.eup %1234 }
 0x327   : > { %838 = vst [vmem:[%s1537_s8 + $0x10] sm:$0xff] %v1235_v55  ;;  %1072 = vmatmul.mubr.f32.vlgmr.msra.gmra.mrb[6].mxu0 %v1235_v55 }
 0x3fa   : > { %v694_v57 = vpop.f32.mrb[6].mxu0 }
 0x3fb   : > { %v700_v58 = vadd.f32 %v694_v57, %v330_v56  ;;  %v1073_v59 = vpop.f32.mrb[7].mxu0 }
 0x3fd   : > { %1236 = vtanh.f32 %v700_v58 }
 0x407   : > { %v1237_v60 = vpop.eup %1236 }
 0x408   : > { %839 = vst [vmem:[%s1537_s8 + $0x18] sm:$0xff] %v1237_v60  ;;  %704 = vst [vmem:[#allocation6] sm:$0xff] %v1237_v60 }
 0x409   : > { %1325 = shalt.err (!%p1322_p7)
}
 0x40a   : > { %s1326_s8 = scalar_lea.hbm %s1665_s11, 512  ;;  %s1330_s7 = scalar_lea.hbm %s1716_s4, 1024 }
 0x40b   : > { %p1327_p9 = scmp.ne.s32.totalorder %s1665_s11, %s1326_s8  ;;  %p1331_p11 = scmp.lt.u32.totalorder %s1665_s11, %s1716_s4 }
 0x40c   : > { %p1332_p6 = scmp.lt.u32.totalorder %s1330_s7, %s1326_s8  ;;  %p1334_p13 = scmp.lt.u32.totalorder %s1326_s8, %s1665_s11 }
 0x40d   : > { %p1328_p1 = pnand %p1327_p9, %p1723_p8 }
 0x40e   : > { %p1333_p12 = por %p1332_p6, %p1331_p11 }
 0x40f   : > { %p1329_p3 = pneg %p1328_p1 }
 0x410   : > { %p1335_p10 = por %p1334_p13, %p1333_p12 }
 0x412   : > { %p1336_p0 = pnand %p1335_p10, %p1329_p3 }
 0x414   : > { %1339 = shalt.err (!%p1336_p0)
}
 0x415   : > { %s1396_s14 = smov 128   ;;  %s1397_s22 = smov 8  }
 0x416   : > { %1176 = dma.vmem_to_hbm [thread:$0]  (%p1723_p8), %s1667_s29, 512, %s1665_s11, %s706_s12, %s1396_s14, %s1396_s14, %s1397_s22  }
 0x417 PF: > { %s734_s20 = sand.u32 1, %s1372_s15   ;;  %p1724_p2 = scmp.ne.s32.totalorder %s1721_s28, 0 }
 0x418   : > { %p1725_p4 = scmp.ge.s32.totalorder %s1384_s18, 2  ;;  %s735_s10 = scalar_lea.sflag [#allocation10], %s734_s20 }
 0x41a   : > { %p1183_p5 = pnand %p1725_p4, %p1724_p2 }
 0x41c   : > { %1367 = dma.done.wait (!%p1183_p5), %s735_s10, 512  }
 0x41d   : > { %1369 = vsyncadd (!%p1183_p5), %s735_s10, 4294966784  ;;  %p17_p7 = scmp.ge.s32.totalorder %s1448_s21, 4   ;;  %s1726_s15 = smov %s1376_s16 }
 0x41e   : > { %s1727_s16 = smov %s1380_s17  ;;  %s1728_s17 = smov %s1460_s24 }
 0x41f   : > { %s1729_s18 = smov %s1448_s21  ;;  %19 = sbr.rel (!%p17_p7) target bundleno = 5 (0x5), region = 131 }
 0x426   :  { %740 = vsyncpa [#allocation9], 1 }
 0x427   :  { %742 = vsyncpa [#allocation9 + $0x1], 1 }
 0x428   :  { %743 = vsyncpa [#allocation10], 1 }
 0x429   :  { %745 = vsyncpa [#allocation10 + $0x1], 1 }
 0x42a   :  { %746 = vsyncmov [#allocation7] }
 0x42d   :  { %s747_s18 = vpop.sfrf %746 }
 0x42e   :  { %p845_p8 = scmp.ne.s32.totalorder %s747_s18, 0 }
 0x430   :  { %751 = shalt.err (%p845_p8)  }
 0x431   :  { %753 = vsyncmov [#allocation7 + $0x1] }
 0x434   :  { %s754_s27 = vpop.sfrf %753 }
 0x435   :  { %p846_p9 = scmp.ne.s32.totalorder %s754_s27, 0 }
 0x437   :  { %758 = shalt.err (%p846_p9)  }
 0x438   :  { %760 = vsyncmov [#allocation7 + $0x2] }
 0x43b   :  { %s761_s28 = vpop.sfrf %760 }
 0x43c   :  { %p847_p1 = scmp.ne.s32.totalorder %s761_s28, 0 }
 0x43e   :  { %765 = shalt.err (%p847_p1)  }

</bundles_post_ra>
